<compile_context>
chip_gen: v7x
topology: tpu7x:2x2x1
jax: 0.10.0
libtpu: 0.0.40
codegen_flags: <defaults>
</compile_context>

<pallas_src>
import functools

import jax
import jax.numpy as jnp
from jax import lax
from jax.experimental import pallas as pl
from jax.experimental.pallas import tpu as pltpu

# Default gamma schedule from the PyTorch module (19 values).
GAMMAS = (1e-06, 1e-05, 0.0001, 0.001, 0.01, 0.1, 1.0, 5.0, 10.0, 15.0,
          20.0, 25.0, 30.0, 35.0, 100.0, 1000.0, 10000.0, 100000.0, 1000000.0)


def _round_up(v, m):
    return ((v + m - 1) // m) * m


def _gamma_kernel_sum(d2):
    """sum_g exp(-g * d2) over the 19-gamma schedule (GAMMAS).

    EUP (transcendental) is the binding VLIW slot on v5e/v6e/v7x, so part of
    the schedule is factored onto the underused VPU slots:
      * {5,10,15,20,25,30,35} as powers of exp(-5*d2)   (1 exp + 6 muls)
      * exp(-1000*d2) = exp(-100*d2)^10                 (1 exp + 4 muls)
    i.e. 12 exps + 10 muls instead of 19 exps.  Chains are kept short so the
    amplified relative error stays ~1e-6 of the (<= 1) term value.
    """
    neg = -d2
    acc = jnp.zeros_like(d2)
    # Small gammas: direct EUP exps.
    for g in (1e-06, 1e-05, 1e-04, 1e-03, 1e-02, 1e-01, 1.0):
        acc = acc + jnp.exp(neg * jnp.float32(g))
    # {5, 10, 15, 20, 25, 30, 35}: powers of exp(-5*d2).
    e5 = jnp.exp(neg * jnp.float32(5.0))
    e = e5
    acc = acc + e
    for _ in range(6):
        e = e * e5
        acc = acc + e
    # {100, 1000}: exp(-1000*d2) = exp(-100*d2)^10 (monotone, underflow-safe).
    e100 = jnp.exp(neg * jnp.float32(100.0))
    e200 = e100 * e100
    e400 = e200 * e200
    e800 = e400 * e400
    acc = acc + e100 + e800 * e200
    # Largest gammas: direct exps (chaining further decades would amplify
    # relative error by 10^2..10^4 and risk the tolerance).
    for g in (1e4, 1e5, 1e6):
        acc = acc + jnp.exp(neg * jnp.float32(g))
    return acc


# ---------------------------------------------------------------------------
# Fused single-step path (N <= 128): one grid step, all three kernel sums.
# ---------------------------------------------------------------------------
def _mmd_fused_kernel(x_ref, y_ref, o_ref, *, tn, n_valid, needs_mask):
    x = x_ref[...]                                    # (tn, D) f32
    y = y_ref[...]                                    # (tn, D) f32
    x2c = jnp.sum(x * x, axis=-1, keepdims=True)      # (tn, 1)
    y2c = jnp.sum(y * y, axis=-1, keepdims=True)
    x2r = jnp.sum(x * x, axis=-1)[None, :]            # (1, tn)
    y2r = jnp.sum(y * y, axis=-1)[None, :]

    rows = lax.broadcasted_iota(jnp.int32, (tn, tn), 0)
    cols = lax.broadcasted_iota(jnp.int32, (tn, tn), 1)
    diag = rows == cols
    valid = jnp.logical_and(rows < n_valid, cols < n_valid)

    def pair_sum(a, b, a2c, b2r, self_kernel):
        # Contract last dims of both operands (no explicit transpose of b);
        # HIGHEST precision keeps d2 f32-accurate (large gammas amplify error).
        ab = lax.dot_general(a, b,
                             dimension_numbers=(((1,), (1,)), ((), ())),
                             preferred_element_type=jnp.float32,
                             precision=lax.Precision.HIGHEST)
        d2 = jnp.maximum(a2c + b2r - 2.0 * ab, 0.0)
        if self_kernel:
            # Self-kernel diagonal distance is analytically zero.
            d2 = jnp.where(diag, jnp.float32(0.0), d2)
        k = _gamma_kernel_sum(d2)
        if needs_mask:
            k = jnp.where(valid, k, jnp.float32(0.0))
        return jnp.sum(k)

    s_xx = pair_sum(x, x, x2c, x2r, True)
    s_yy = pair_sum(y, y, y2c, y2r, True)
    s_xy = pair_sum(x, y, x2c, y2r, False)
    total = s_xx + s_yy - 2.0 * s_xy
    o_ref[...] = total + jnp.zeros_like(o_ref)


# ---------------------------------------------------------------------------
# Tiled path (N > 128): grid = (p, i, j); per-(p, i) accumulator over j.
# ---------------------------------------------------------------------------
def _mmd_tiles_kernel(a_ref, b_ref, a2_ref, b2_ref, o_ref, *,
                      tn, n_valid, needs_mask):
    p = pl.program_id(0)          # 0: Kxx, 1: Kyy, 2: Kxy   ("parallel")
    i = pl.program_id(1)          # row tile                 ("parallel")
    j = pl.program_id(2)          # col tile                 ("arbitrary")

    # Init the per-(p, i) accumulator on its first j tile.
    @pl.when(j == 0)
    def _init():
        o_ref[...] = jnp.zeros_like(o_ref)

    is_self = p < 2                           # Kxx / Kyy are symmetric
    do_tile = jnp.logical_or(jnp.logical_not(is_self), j >= i)

    @pl.when(do_tile)
    def _compute():
        a = a_ref[...]                        # (tn, D) f32
        b = b_ref[...]                        # (tn, D) f32
        a2 = a2_ref[...]                      # (tn, 1) precomputed row norms
        b2 = b2_ref[...]                      # (1, tn) precomputed col norms
        ab = lax.dot_general(a, b,
                             dimension_numbers=(((1,), (1,)), ((), ())),
                             preferred_element_type=jnp.float32,
                             precision=lax.Precision.HIGHEST)
        d2 = jnp.maximum(a2 + b2 - 2.0 * ab, 0.0)       # (tn, tn)

        rows = lax.broadcasted_iota(jnp.int32, (tn, tn), 0)
        cols = lax.broadcasted_iota(jnp.int32, (tn, tn), 1)

        # Self kernels: the diagonal distance is analytically zero.
        on_diag = jnp.logical_and(jnp.logical_and(is_self, i == j), rows == cols)
        d2 = jnp.where(on_diag, jnp.float32(0.0), d2)

        acc = _gamma_kernel_sum(d2)

        if needs_mask:                                   # static: padded N only
            valid = jnp.logical_and(i * tn + rows < n_valid,
                                    j * tn + cols < n_valid)
            acc = jnp.where(valid, acc, jnp.float32(0.0))

        # Strictly-upper tiles of the symmetric matrices stand in for two tiles.
        w = jnp.where(jnp.logical_and(is_self, j > i),
                      jnp.float32(2.0), jnp.float32(1.0))
        o_ref[...] += w * jnp.sum(acc)


def mmd_gaussian_pallas(x, y):
    """Gaussian-kernel MMD between x and y, both (N, D)."""
    assert x.shape == y.shape, "wrapper assumes equal shapes (see mmd())"
    x = jnp.asarray(x, jnp.float32)
    y = jnp.asarray(y, jnp.float32)
    n, d = x.shape
    scale = jnp.float32(1.0 / (len(GAMMAS) * n * n))

    if n <= 128:
        # ---- fused single-step path (production shape, N ~ 8) ----
        tn = _round_up(n, 8)
        needs_mask = tn != n
        if needs_mask:
            x = jnp.pad(x, ((0, tn - n), (0, 0)))
            y = jnp.pad(y, ((0, tn - n), (0, 0)))
        kernel = functools.partial(_mmd_fused_kernel, tn=tn, n_valid=n,
                                   needs_mask=needs_mask)
        out = pl.pallas_call(
            kernel,
            out_shape=jax.ShapeDtypeStruct((1, 1), jnp.float32),
            grid=(1,),
            in_specs=[pl.BlockSpec((tn, d), lambda i: (0, 0)),
                      pl.BlockSpec((tn, d), lambda i: (0, 0))],
            out_specs=pl.BlockSpec((1, 1), lambda i: (0, 0)),
            compiler_params=pltpu.CompilerParams(
                dimension_semantics=("arbitrary",)),
        )(x, y)
        return out[0, 0] * scale

    # ---- tiled path (N > 128): 128x128 compute tiles ----
    tn = 128
    n_pad = _round_up(n, tn)
    nt = n_pad // tn
    needs_mask = n_pad != n
    if needs_mask:
        x = jnp.pad(x, ((0, n_pad - n), (0, 0)))
        y = jnp.pad(y, ((0, n_pad - n), (0, 0)))
    xy = jnp.stack([x, y], axis=0)            # (2, n_pad, d)
    sqn = jnp.sum(xy * xy, axis=-1)           # (2, n_pad) precomputed norms
    sq_col = sqn[:, :, None]                  # (2, n_pad, 1)  -> a2 blocks
    sq_row = sqn[:, None, :]                  # (2, 1, n_pad)  -> b2 blocks (lane-dense)

    kernel = functools.partial(_mmd_tiles_kernel, tn=tn, n_valid=n,
                               needs_mask=needs_mask)
    sums = pl.pallas_call(
        kernel,
        out_shape=jax.ShapeDtypeStruct((3, nt, 1, 1), jnp.float32),
        grid=(3, nt, nt),
        in_specs=[
            # a operand: x for Kxx/Kxy (p=0,2), y for Kyy (p=1)
            pl.BlockSpec((None, tn, d), lambda p, i, j: (p % 2, i, 0)),
            # b operand: x for Kxx (p=0), y for Kyy/Kxy (p=1,2)
            pl.BlockSpec((None, tn, d), lambda p, i, j: ((p + 1) // 2, j, 0)),
            # precomputed squared norms, row-tile (column vector) form
            pl.BlockSpec((None, tn, 1), lambda p, i, j: (p % 2, i, 0)),
            # precomputed squared norms, col-tile (row vector, lane-dense) form
            pl.BlockSpec((None, 1, tn), lambda p, i, j: ((p + 1) // 2, 0, j)),
        ],
        # One accumulator per (p, i): both axes can be sharded across v7x cores.
        out_specs=pl.BlockSpec((None, 1, 1, 1), lambda p, i, j: (p, i, 0, 0)),
        compiler_params=pltpu.CompilerParams(
            dimension_semantics=("parallel", "parallel", "arbitrary")),
    )(xy, xy, sq_col, sq_row)

    s = jnp.sum(sums, axis=(1, 2, 3))         # (3,) raw sums Kxx, Kyy, Kxy
    return (s[0] + s[1] - 2.0 * s[2]) * scale


def mmd(x, y, kernel_type="gaussian", key=None):
    """Forward pass matching MMD.forward semantics."""
    x = jnp.asarray(x, jnp.float32)
    y = jnp.asarray(y, jnp.float32)
    if x.shape[0] == 1 or y.shape[0] == 1:
        return jnp.float32(0.0)
    if x.shape[0] != y.shape[0]:
        # torch uses randperm; deterministic PRNG permutation here.
        key = jax.random.PRNGKey(0) if key is None else key
        if x.shape[0] > y.shape[0]:
            idx = jax.random.permutation(key, x.shape[0])[: y.shape[0]]
            x = x[idx]
        else:
            idx = jax.random.permutation(key, y.shape[0])[: x.shape[0]]
            y = y[idx]
    if kernel_type == "gaussian":
        return mmd_gaussian_pallas(x, y)
    # Non-gaussian (mean/covariance) branch kept in plain JAX; the default
    # forward path ('gaussian') is the Pallas hot path.
    mean_x = jnp.mean(x, axis=0, keepdims=True)
    mean_y = jnp.mean(y, axis=0, keepdims=True)
    cent_x = x - mean_x
    cent_y = y - mean_y
    cova_x = cent_x.T @ cent_x / (x.shape[0] - 1)
    cova_y = cent_y.T @ cent_y / (y.shape[0] - 1)
    return jnp.mean((mean_x - mean_y) ** 2) + jnp.mean((cova_x - cova_y) ** 2)


def _mmd_reference(x, y):
    """Pure-JAX reference (explicit pairwise differences), for checking."""
    x = jnp.asarray(x, jnp.float32)
    y = jnp.asarray(y, jnp.float32)

    def kmean(a, b):
        d2 = jnp.sum((a[:, None, :] - b[None, :, :]) ** 2, axis=-1)
        k = sum(jnp.exp(-d2 * jnp.float32(g)) for g in GAMMAS) / len(GAMMAS)
        return jnp.mean(k)

    return kmean(x, x) + kmean(y, y) - 2.0 * kmean(x, y)


if __name__ == "__main__":
    key = jax.random.PRNGKey(0)
    kx, ky = jax.random.split(key)

    # Default module shape: (batch_size, z_dim) -> fused single-step path.
    batch, z_dim = 8, 32
    x = jax.random.normal(kx, (batch, z_dim), dtype=jnp.float32)
    y = 0.5 * jax.random.normal(ky, (batch, z_dim), dtype=jnp.float32) + 0.3

    out = jax.block_until_ready(mmd(x, y))
    ref = _mmd_reference(x, y)
    assert jnp.allclose(out, ref, atol=3e-5, rtol=1e-4), (out, ref)

    # Larger case exercising the tiled / symmetric / padded-mask / (p, i)
    # parallel-accumulator path (N = 136 -> 128 tiles, 2x2 tile grid, mask).
    kx2, ky2 = jax.random.split(jax.random.PRNGKey(1))
    batch2 = 136
    x2 = jax.random.normal(kx2, (batch2, z_dim), dtype=jnp.float32)
    y2 = 0.5 * jax.random.normal(ky2, (batch2, z_dim), dtype=jnp.float32) + 0.3

    out2 = jax.block_until_ready(mmd(x2, y2))
    ref2 = _mmd_reference(x2, y2)
    assert jnp.allclose(out2, ref2, atol=3e-5, rtol=1e-4), (out2, ref2)

    print("KERNEL_OK")
</pallas_src>

<mosaic_0001>
module attributes {stable_mosaic.version = 11 : i64} {
  func.func @_mmd_fused_kernel(%arg0: i32, %arg1: memref<8x32xf32, #tpu.memory_space<vmem>>, %arg2: memref<8x32xf32, #tpu.memory_space<vmem>>, %arg3: memref<1x1xf32, #tpu.memory_space<vmem>>) attributes {dimension_semantics = [#tpu.dimension_semantics<arbitrary>], iteration_bounds = array<i64: 1>, scalar_prefetch = 0 : i64, scratch_operands = 0 : i64, tpu.core_type = #tpu.core_type<tc>, window_params = [{pipeline_mode = #tpu.pipeline_mode<synchronous>, transform_indices = @transform_0, window_bounds = array<i64: 8, 32>}, {pipeline_mode = #tpu.pipeline_mode<synchronous>, transform_indices = @transform_1, window_bounds = array<i64: 8, 32>}, {pipeline_mode = #tpu.pipeline_mode<synchronous>, transform_indices = @transform_2, window_bounds = array<i64: 1, 1>}]} {
    %c0 = arith.constant 0 : index
    %c0_0 = arith.constant 0 : index
    %0 = vector.load %arg1[%c0, %c0_0] : memref<8x32xf32, #tpu.memory_space<vmem>>, vector<8x32xf32>
    %c0_1 = arith.constant 0 : index
    %c0_2 = arith.constant 0 : index
    %1 = vector.load %arg2[%c0_1, %c0_2] : memref<8x32xf32, #tpu.memory_space<vmem>>, vector<8x32xf32>
    %2 = arith.mulf %0, %0 : vector<8x32xf32>
    %cst = arith.constant dense<0.000000e+00> : vector<8xf32>
    %3 = vector.multi_reduction <add>, %2, %cst [1] : vector<8x32xf32> to vector<8xf32>
    %4 = vector.shape_cast %3 : vector<8xf32> to vector<8x1xf32>
    %5 = arith.mulf %1, %1 : vector<8x32xf32>
    %cst_3 = arith.constant dense<0.000000e+00> : vector<8xf32>
    %6 = vector.multi_reduction <add>, %5, %cst_3 [1] : vector<8x32xf32> to vector<8xf32>
    %7 = vector.shape_cast %6 : vector<8xf32> to vector<8x1xf32>
    %8 = arith.mulf %0, %0 : vector<8x32xf32>
    %cst_4 = arith.constant dense<0.000000e+00> : vector<8xf32>
    %9 = vector.multi_reduction <add>, %8, %cst_4 [1] : vector<8x32xf32> to vector<8xf32>
    %10 = vector.shape_cast %9 : vector<8xf32> to vector<1x8xf32>
    %11 = arith.mulf %1, %1 : vector<8x32xf32>
    %cst_5 = arith.constant dense<0.000000e+00> : vector<8xf32>
    %12 = vector.multi_reduction <add>, %11, %cst_5 [1] : vector<8x32xf32> to vector<8xf32>
    %13 = vector.shape_cast %12 : vector<8xf32> to vector<1x8xf32>
    %14 = tpu.iota {dimensions = array<i32: 0>} : vector<8x8xi32>
    %15 = tpu.iota {dimensions = array<i32: 1>} : vector<8x8xi32>
    %16 = arith.cmpi eq, %14, %15 : vector<8x8xi32>
    %cst_6 = arith.constant dense<0.000000e+00> : vector<8x8xf32>
    %17 = tpu.matmul %0, %0, %cst_6 {dimension_numbers = #tpu.dot_dimension_numbers<[1], [1], [0], [0], [0, 0, 1, 0], [], []>, precision = #tpu.contract_precision<fp32>} : vector<8x32xf32>, vector<8x32xf32>, vector<8x8xf32> -> vector<8x8xf32>
    %18 = vector.broadcast %4 : vector<8x1xf32> to vector<8x8xf32>
    %19 = vector.broadcast %10 : vector<1x8xf32> to vector<8x8xf32>
    %20 = arith.addf %18, %19 : vector<8x8xf32>
    %cst_7 = arith.constant 2.000000e+00 : f32
    %21 = vector.broadcast %cst_7 : f32 to vector<8x8xf32>
    %22 = arith.mulf %21, %17 : vector<8x8xf32>
    %23 = arith.subf %20, %22 : vector<8x8xf32>
    %cst_8 = arith.constant 0.000000e+00 : f32
    %24 = vector.broadcast %cst_8 : f32 to vector<8x8xf32>
    %25 = arith.maximumf %23, %24 : vector<8x8xf32>
    %cst_9 = arith.constant 0.000000e+00 : f32
    %26 = vector.broadcast %cst_9 : f32 to vector<8x8xf32>
    %27 = arith.select %16, %26, %25 : vector<8x8xi1>, vector<8x8xf32>
    %cst_10 = arith.constant 0.000000e+00 : f32
    %28 = vector.broadcast %cst_10 : f32 to vector<8x8xf32>
    %29 = arith.subf %28, %27 : vector<8x8xf32>
    %cst_11 = arith.constant 0.000000e+00 : f32
    %30 = vector.broadcast %cst_11 : f32 to vector<8x8xf32>
    %cst_12 = arith.constant 9.99999997E-7 : f32
    %31 = vector.broadcast %cst_12 : f32 to vector<8x8xf32>
    %32 = arith.mulf %29, %31 : vector<8x8xf32>
    %33 = math.exp %32 : vector<8x8xf32>
    %34 = arith.addf %30, %33 : vector<8x8xf32>
    %cst_13 = arith.constant 9.99999974E-6 : f32
    %35 = vector.broadcast %cst_13 : f32 to vector<8x8xf32>
    %36 = arith.mulf %29, %35 : vector<8x8xf32>
    %37 = math.exp %36 : vector<8x8xf32>
    %38 = arith.addf %34, %37 : vector<8x8xf32>
    %cst_14 = arith.constant 9.99999974E-5 : f32
    %39 = vector.broadcast %cst_14 : f32 to vector<8x8xf32>
    %40 = arith.mulf %29, %39 : vector<8x8xf32>
    %41 = math.exp %40 : vector<8x8xf32>
    %42 = arith.addf %38, %41 : vector<8x8xf32>
    %cst_15 = arith.constant 1.000000e-03 : f32
    %43 = vector.broadcast %cst_15 : f32 to vector<8x8xf32>
    %44 = arith.mulf %29, %43 : vector<8x8xf32>
    %45 = math.exp %44 : vector<8x8xf32>
    %46 = arith.addf %42, %45 : vector<8x8xf32>
    %cst_16 = arith.constant 0.00999999977 : f32
    %47 = vector.broadcast %cst_16 : f32 to vector<8x8xf32>
    %48 = arith.mulf %29, %47 : vector<8x8xf32>
    %49 = math.exp %48 : vector<8x8xf32>
    %50 = arith.addf %46, %49 : vector<8x8xf32>
    %cst_17 = arith.constant 1.000000e-01 : f32
    %51 = vector.broadcast %cst_17 : f32 to vector<8x8xf32>
    %52 = arith.mulf %29, %51 : vector<8x8xf32>
    %53 = math.exp %52 : vector<8x8xf32>
    %54 = arith.addf %50, %53 : vector<8x8xf32>
    %cst_18 = arith.constant 1.000000e+00 : f32
    %55 = vector.broadcast %cst_18 : f32 to vector<8x8xf32>
    %56 = arith.mulf %29, %55 : vector<8x8xf32>
    %57 = math.exp %56 : vector<8x8xf32>
    %58 = arith.addf %54, %57 : vector<8x8xf32>
    %cst_19 = arith.constant 5.000000e+00 : f32
    %59 = vector.broadcast %cst_19 : f32 to vector<8x8xf32>
    %60 = arith.mulf %29, %59 : vector<8x8xf32>
    %61 = math.exp %60 : vector<8x8xf32>
    %62 = arith.addf %58, %61 : vector<8x8xf32>
    %63 = arith.mulf %61, %61 : vector<8x8xf32>
    %64 = arith.addf %62, %63 : vector<8x8xf32>
    %65 = arith.mulf %63, %61 : vector<8x8xf32>
    %66 = arith.addf %64, %65 : vector<8x8xf32>
    %67 = arith.mulf %65, %61 : vector<8x8xf32>
    %68 = arith.addf %66, %67 : vector<8x8xf32>
    %69 = arith.mulf %67, %61 : vector<8x8xf32>
    %70 = arith.addf %68, %69 : vector<8x8xf32>
    %71 = arith.mulf %69, %61 : vector<8x8xf32>
    %72 = arith.addf %70, %71 : vector<8x8xf32>
    %73 = arith.mulf %71, %61 : vector<8x8xf32>
    %74 = arith.addf %72, %73 : vector<8x8xf32>
    %cst_20 = arith.constant 1.000000e+02 : f32
    %75 = vector.broadcast %cst_20 : f32 to vector<8x8xf32>
    %76 = arith.mulf %29, %75 : vector<8x8xf32>
    %77 = math.exp %76 : vector<8x8xf32>
    %78 = arith.mulf %77, %77 : vector<8x8xf32>
    %79 = arith.mulf %78, %78 : vector<8x8xf32>
    %80 = arith.mulf %79, %79 : vector<8x8xf32>
    %81 = arith.addf %74, %77 : vector<8x8xf32>
    %82 = arith.mulf %80, %78 : vector<8x8xf32>
    %83 = arith.addf %81, %82 : vector<8x8xf32>
    %cst_21 = arith.constant 1.000000e+04 : f32
    %84 = vector.broadcast %cst_21 : f32 to vector<8x8xf32>
    %85 = arith.mulf %29, %84 : vector<8x8xf32>
    %86 = math.exp %85 : vector<8x8xf32>
    %87 = arith.addf %83, %86 : vector<8x8xf32>
    %cst_22 = arith.constant 1.000000e+05 : f32
    %88 = vector.broadcast %cst_22 : f32 to vector<8x8xf32>
    %89 = arith.mulf %29, %88 : vector<8x8xf32>
    %90 = math.exp %89 : vector<8x8xf32>
    %91 = arith.addf %87, %90 : vector<8x8xf32>
    %cst_23 = arith.constant 1.000000e+06 : f32
    %92 = vector.broadcast %cst_23 : f32 to vector<8x8xf32>
    %93 = arith.mulf %29, %92 : vector<8x8xf32>
    %94 = math.exp %93 : vector<8x8xf32>
    %95 = arith.addf %91, %94 : vector<8x8xf32>
    %96 = vector.shape_cast %95 : vector<8x8xf32> to vector<1x8x8xf32>
    %cst_24 = arith.constant dense<0.000000e+00> : vector<1xf32>
    %97 = vector.multi_reduction <add>, %96, %cst_24 [1, 2] : vector<1x8x8xf32> to vector<1xf32>
    %98 = vector.shape_cast %97 : vector<1xf32> to vector<1x1x1xf32>
    %99 = vector.extract %98[0, 0, 0] : f32 from vector<1x1x1xf32>
    %cst_25 = arith.constant dense<0.000000e+00> : vector<8x8xf32>
    %100 = tpu.matmul %1, %1, %cst_25 {dimension_numbers = #tpu.dot_dimension_numbers<[1], [1], [0], [0], [0, 0, 1, 0], [], []>, precision = #tpu.contract_precision<fp32>} : vector<8x32xf32>, vector<8x32xf32>, vector<8x8xf32> -> vector<8x8xf32>
    %101 = vector.broadcast %7 : vector<8x1xf32> to vector<8x8xf32>
    %102 = vector.broadcast %13 : vector<1x8xf32> to vector<8x8xf32>
    %103 = arith.addf %101, %102 : vector<8x8xf32>
    %cst_26 = arith.constant 2.000000e+00 : f32
    %104 = vector.broadcast %cst_26 : f32 to vector<8x8xf32>
    %105 = arith.mulf %104, %100 : vector<8x8xf32>
    %106 = arith.subf %103, %105 : vector<8x8xf32>
    %cst_27 = arith.constant 0.000000e+00 : f32
    %107 = vector.broadcast %cst_27 : f32 to vector<8x8xf32>
    %108 = arith.maximumf %106, %107 : vector<8x8xf32>
    %cst_28 = arith.constant 0.000000e+00 : f32
    %109 = vector.broadcast %cst_28 : f32 to vector<8x8xf32>
    %110 = arith.select %16, %109, %108 : vector<8x8xi1>, vector<8x8xf32>
    %cst_29 = arith.constant 0.000000e+00 : f32
    %111 = vector.broadcast %cst_29 : f32 to vector<8x8xf32>
    %112 = arith.subf %111, %110 : vector<8x8xf32>
    %cst_30 = arith.constant 0.000000e+00 : f32
    %113 = vector.broadcast %cst_30 : f32 to vector<8x8xf32>
    %cst_31 = arith.constant 9.99999997E-7 : f32
    %114 = vector.broadcast %cst_31 : f32 to vector<8x8xf32>
    %115 = arith.mulf %112, %114 : vector<8x8xf32>
    %116 = math.exp %115 : vector<8x8xf32>
    %117 = arith.addf %113, %116 : vector<8x8xf32>
    %cst_32 = arith.constant 9.99999974E-6 : f32
    %118 = vector.broadcast %cst_32 : f32 to vector<8x8xf32>
    %119 = arith.mulf %112, %118 : vector<8x8xf32>
    %120 = math.exp %119 : vector<8x8xf32>
    %121 = arith.addf %117, %120 : vector<8x8xf32>
    %cst_33 = arith.constant 9.99999974E-5 : f32
    %122 = vector.broadcast %cst_33 : f32 to vector<8x8xf32>
    %123 = arith.mulf %112, %122 : vector<8x8xf32>
    %124 = math.exp %123 : vector<8x8xf32>
    %125 = arith.addf %121, %124 : vector<8x8xf32>
    %cst_34 = arith.constant 1.000000e-03 : f32
    %126 = vector.broadcast %cst_34 : f32 to vector<8x8xf32>
    %127 = arith.mulf %112, %126 : vector<8x8xf32>
    %128 = math.exp %127 : vector<8x8xf32>
    %129 = arith.addf %125, %128 : vector<8x8xf32>
    %cst_35 = arith.constant 0.00999999977 : f32
    %130 = vector.broadcast %cst_35 : f32 to vector<8x8xf32>
    %131 = arith.mulf %112, %130 : vector<8x8xf32>
    %132 = math.exp %131 : vector<8x8xf32>
    %133 = arith.addf %129, %132 : vector<8x8xf32>
    %cst_36 = arith.constant 1.000000e-01 : f32
    %134 = vector.broadcast %cst_36 : f32 to vector<8x8xf32>
    %135 = arith.mulf %112, %134 : vector<8x8xf32>
    %136 = math.exp %135 : vector<8x8xf32>
    %137 = arith.addf %133, %136 : vector<8x8xf32>
    %cst_37 = arith.constant 1.000000e+00 : f32
    %138 = vector.broadcast %cst_37 : f32 to vector<8x8xf32>
    %139 = arith.mulf %112, %138 : vector<8x8xf32>
    %140 = math.exp %139 : vector<8x8xf32>
    %141 = arith.addf %137, %140 : vector<8x8xf32>
    %cst_38 = arith.constant 5.000000e+00 : f32
    %142 = vector.broadcast %cst_38 : f32 to vector<8x8xf32>
    %143 = arith.mulf %112, %142 : vector<8x8xf32>
    %144 = math.exp %143 : vector<8x8xf32>
    %145 = arith.addf %141, %144 : vector<8x8xf32>
    %146 = arith.mulf %144, %144 : vector<8x8xf32>
    %147 = arith.addf %145, %146 : vector<8x8xf32>
    %148 = arith.mulf %146, %144 : vector<8x8xf32>
    %149 = arith.addf %147, %148 : vector<8x8xf32>
    %150 = arith.mulf %148, %144 : vector<8x8xf32>
    %151 = arith.addf %149, %150 : vector<8x8xf32>
    %152 = arith.mulf %150, %144 : vector<8x8xf32>
    %153 = arith.addf %151, %152 : vector<8x8xf32>
    %154 = arith.mulf %152, %144 : vector<8x8xf32>
    %155 = arith.addf %153, %154 : vector<8x8xf32>
    %156 = arith.mulf %154, %144 : vector<8x8xf32>
    %157 = arith.addf %155, %156 : vector<8x8xf32>
    %cst_39 = arith.constant 1.000000e+02 : f32
    %158 = vector.broadcast %cst_39 : f32 to vector<8x8xf32>
    %159 = arith.mulf %112, %158 : vector<8x8xf32>
    %160 = math.exp %159 : vector<8x8xf32>
    %161 = arith.mulf %160, %160 : vector<8x8xf32>
    %162 = arith.mulf %161, %161 : vector<8x8xf32>
    %163 = arith.mulf %162, %162 : vector<8x8xf32>
    %164 = arith.addf %157, %160 : vector<8x8xf32>
    %165 = arith.mulf %163, %161 : vector<8x8xf32>
    %166 = arith.addf %164, %165 : vector<8x8xf32>
    %cst_40 = arith.constant 1.000000e+04 : f32
    %167 = vector.broadcast %cst_40 : f32 to vector<8x8xf32>
    %168 = arith.mulf %112, %167 : vector<8x8xf32>
    %169 = math.exp %168 : vector<8x8xf32>
    %170 = arith.addf %166, %169 : vector<8x8xf32>
    %cst_41 = arith.constant 1.000000e+05 : f32
    %171 = vector.broadcast %cst_41 : f32 to vector<8x8xf32>
    %172 = arith.mulf %112, %171 : vector<8x8xf32>
    %173 = math.exp %172 : vector<8x8xf32>
    %174 = arith.addf %170, %173 : vector<8x8xf32>
    %cst_42 = arith.constant 1.000000e+06 : f32
    %175 = vector.broadcast %cst_42 : f32 to vector<8x8xf32>
    %176 = arith.mulf %112, %175 : vector<8x8xf32>
    %177 = math.exp %176 : vector<8x8xf32>
    %178 = arith.addf %174, %177 : vector<8x8xf32>
    %179 = vector.shape_cast %178 : vector<8x8xf32> to vector<1x8x8xf32>
    %cst_43 = arith.constant dense<0.000000e+00> : vector<1xf32>
    %180 = vector.multi_reduction <add>, %179, %cst_43 [1, 2] : vector<1x8x8xf32> to vector<1xf32>
    %181 = vector.shape_cast %180 : vector<1xf32> to vector<1x1x1xf32>
    %182 = vector.extract %181[0, 0, 0] : f32 from vector<1x1x1xf32>
    %cst_44 = arith.constant dense<0.000000e+00> : vector<8x8xf32>
    %183 = tpu.matmul %0, %1, %cst_44 {dimension_numbers = #tpu.dot_dimension_numbers<[1], [1], [0], [0], [0, 0, 1, 0], [], []>, precision = #tpu.contract_precision<fp32>} : vector<8x32xf32>, vector<8x32xf32>, vector<8x8xf32> -> vector<8x8xf32>
    %184 = vector.broadcast %4 : vector<8x1xf32> to vector<8x8xf32>
    %185 = vector.broadcast %13 : vector<1x8xf32> to vector<8x8xf32>
    %186 = arith.addf %184, %185 : vector<8x8xf32>
    %cst_45 = arith.constant 2.000000e+00 : f32
    %187 = vector.broadcast %cst_45 : f32 to vector<8x8xf32>
    %188 = arith.mulf %187, %183 : vector<8x8xf32>
    %189 = arith.subf %186, %188 : vector<8x8xf32>
    %cst_46 = arith.constant 0.000000e+00 : f32
    %190 = vector.broadcast %cst_46 : f32 to vector<8x8xf32>
    %191 = arith.maximumf %189, %190 : vector<8x8xf32>
    %cst_47 = arith.constant 0.000000e+00 : f32
    %192 = vector.broadcast %cst_47 : f32 to vector<8x8xf32>
    %193 = arith.subf %192, %191 : vector<8x8xf32>
    %cst_48 = arith.constant 0.000000e+00 : f32
    %194 = vector.broadcast %cst_48 : f32 to vector<8x8xf32>
    %cst_49 = arith.constant 9.99999997E-7 : f32
    %195 = vector.broadcast %cst_49 : f32 to vector<8x8xf32>
    %196 = arith.mulf %193, %195 : vector<8x8xf32>
    %197 = math.exp %196 : vector<8x8xf32>
    %198 = arith.addf %194, %197 : vector<8x8xf32>
    %cst_50 = arith.constant 9.99999974E-6 : f32
    %199 = vector.broadcast %cst_50 : f32 to vector<8x8xf32>
    %200 = arith.mulf %193, %199 : vector<8x8xf32>
    %201 = math.exp %200 : vector<8x8xf32>
    %202 = arith.addf %198, %201 : vector<8x8xf32>
    %cst_51 = arith.constant 9.99999974E-5 : f32
    %203 = vector.broadcast %cst_51 : f32 to vector<8x8xf32>
    %204 = arith.mulf %193, %203 : vector<8x8xf32>
    %205 = math.exp %204 : vector<8x8xf32>
    %206 = arith.addf %202, %205 : vector<8x8xf32>
    %cst_52 = arith.constant 1.000000e-03 : f32
    %207 = vector.broadcast %cst_52 : f32 to vector<8x8xf32>
    %208 = arith.mulf %193, %207 : vector<8x8xf32>
    %209 = math.exp %208 : vector<8x8xf32>
    %210 = arith.addf %206, %209 : vector<8x8xf32>
    %cst_53 = arith.constant 0.00999999977 : f32
    %211 = vector.broadcast %cst_53 : f32 to vector<8x8xf32>
    %212 = arith.mulf %193, %211 : vector<8x8xf32>
    %213 = math.exp %212 : vector<8x8xf32>
    %214 = arith.addf %210, %213 : vector<8x8xf32>
    %cst_54 = arith.constant 1.000000e-01 : f32
    %215 = vector.broadcast %cst_54 : f32 to vector<8x8xf32>
    %216 = arith.mulf %193, %215 : vector<8x8xf32>
    %217 = math.exp %216 : vector<8x8xf32>
    %218 = arith.addf %214, %217 : vector<8x8xf32>
    %cst_55 = arith.constant 1.000000e+00 : f32
    %219 = vector.broadcast %cst_55 : f32 to vector<8x8xf32>
    %220 = arith.mulf %193, %219 : vector<8x8xf32>
    %221 = math.exp %220 : vector<8x8xf32>
    %222 = arith.addf %218, %221 : vector<8x8xf32>
    %cst_56 = arith.constant 5.000000e+00 : f32
    %223 = vector.broadcast %cst_56 : f32 to vector<8x8xf32>
    %224 = arith.mulf %193, %223 : vector<8x8xf32>
    %225 = math.exp %224 : vector<8x8xf32>
    %226 = arith.addf %222, %225 : vector<8x8xf32>
    %227 = arith.mulf %225, %225 : vector<8x8xf32>
    %228 = arith.addf %226, %227 : vector<8x8xf32>
    %229 = arith.mulf %227, %225 : vector<8x8xf32>
    %230 = arith.addf %228, %229 : vector<8x8xf32>
    %231 = arith.mulf %229, %225 : vector<8x8xf32>
    %232 = arith.addf %230, %231 : vector<8x8xf32>
    %233 = arith.mulf %231, %225 : vector<8x8xf32>
    %234 = arith.addf %232, %233 : vector<8x8xf32>
    %235 = arith.mulf %233, %225 : vector<8x8xf32>
    %236 = arith.addf %234, %235 : vector<8x8xf32>
    %237 = arith.mulf %235, %225 : vector<8x8xf32>
    %238 = arith.addf %236, %237 : vector<8x8xf32>
    %cst_57 = arith.constant 1.000000e+02 : f32
    %239 = vector.broadcast %cst_57 : f32 to vector<8x8xf32>
    %240 = arith.mulf %193, %239 : vector<8x8xf32>
    %241 = math.exp %240 : vector<8x8xf32>
    %242 = arith.mulf %241, %241 : vector<8x8xf32>
    %243 = arith.mulf %242, %242 : vector<8x8xf32>
    %244 = arith.mulf %243, %243 : vector<8x8xf32>
    %245 = arith.addf %238, %241 : vector<8x8xf32>
    %246 = arith.mulf %244, %242 : vector<8x8xf32>
    %247 = arith.addf %245, %246 : vector<8x8xf32>
    %cst_58 = arith.constant 1.000000e+04 : f32
    %248 = vector.broadcast %cst_58 : f32 to vector<8x8xf32>
    %249 = arith.mulf %193, %248 : vector<8x8xf32>
    %250 = math.exp %249 : vector<8x8xf32>
    %251 = arith.addf %247, %250 : vector<8x8xf32>
    %cst_59 = arith.constant 1.000000e+05 : f32
    %252 = vector.broadcast %cst_59 : f32 to vector<8x8xf32>
    %253 = arith.mulf %193, %252 : vector<8x8xf32>
    %254 = math.exp %253 : vector<8x8xf32>
    %255 = arith.addf %251, %254 : vector<8x8xf32>
    %cst_60 = arith.constant 1.000000e+06 : f32
    %256 = vector.broadcast %cst_60 : f32 to vector<8x8xf32>
    %257 = arith.mulf %193, %256 : vector<8x8xf32>
    %258 = math.exp %257 : vector<8x8xf32>
    %259 = arith.addf %255, %258 : vector<8x8xf32>
    %260 = vector.shape_cast %259 : vector<8x8xf32> to vector<1x8x8xf32>
    %cst_61 = arith.constant dense<0.000000e+00> : vector<1xf32>
    %261 = vector.multi_reduction <add>, %260, %cst_61 [1, 2] : vector<1x8x8xf32> to vector<1xf32>
    %262 = vector.shape_cast %261 : vector<1xf32> to vector<1x1x1xf32>
    %263 = vector.extract %262[0, 0, 0] : f32 from vector<1x1x1xf32>
    %264 = arith.addf %99, %182 : f32
    %cst_62 = arith.constant 2.000000e+00 : f32
    %265 = arith.mulf %cst_62, %263 : f32
    %266 = arith.subf %264, %265 : f32
    %cst_63 = arith.constant 0.000000e+00 : f32
    %267 = vector.broadcast %cst_63 : f32 to vector<1x1xf32>
    %268 = vector.broadcast %266 : f32 to vector<1x1xf32>
    %269 = arith.addf %268, %267 : vector<1x1xf32>
    %c0_64 = arith.constant 0 : index
    %c0_65 = arith.constant 0 : index
    %270 = vector.load %arg3[%c0_64, %c0_65] : memref<1x1xf32, #tpu.memory_space<vmem>>, vector<1x1xf32>
    tpu.vector_store %arg3[%c0_64, %c0_65], %269 {strides = array<i32>} : memref<1x1xf32, #tpu.memory_space<vmem>>, vector<1x1xf32>,
    return
  }
  func.func @transform_0(%arg0: i32) -> (i32, i32) {
    %c0_i32 = arith.constant 0 : i32
    %c0_i32_0 = arith.constant 0 : i32
    %c0_i32_1 = arith.constant 0 : i32
    return %c0_i32, %c0_i32_0 : i32, i32
  }
  func.func @transform_1(%arg0: i32) -> (i32, i32) {
    %c0_i32 = arith.constant 0 : i32
    %c0_i32_0 = arith.constant 0 : i32
    %c0_i32_1 = arith.constant 0 : i32
    return %c0_i32, %c0_i32_0 : i32, i32
  }
  func.func @transform_2(%arg0: i32) -> (i32, i32) {
    %c0_i32 = arith.constant 0 : i32
    %c0_i32_0 = arith.constant 0 : i32
    %c0_i32_1 = arith.constant 0 : i32
    return %c0_i32, %c0_i32_0 : i32, i32
  }
}

</mosaic_0001>

<bundles_post_ra>
// kernel: tpu_custom_call.1
= control target key start
LH: loop header
LB: loop body
LE: loop exit
PB: predicated region body
PF: predicated region fallthrough
CT: control target
= control target key end

     0   :  { %7 = vsyncpa [#allocation3], 0  ;;  %s2207_s0 = inlined_call_operand.hbm [shape: f32[8,32], index: 0, kind: input, shape index: {}]   ;;  %s2208_s1 = inlined_call_operand.hbm [shape: f32[8,32], index: 1, kind: input, shape index: {}]   ;;  %s2209_s2 = inlined_call_operand.hbm [shape: f32[1,1], index: 2, kind: output, shape index: {}]  }
   0x1   :  { %8 = vsyncpa [#allocation6], 0 }
   0x2   :  { %9 = vsyncpa [#allocation4], 0  ;;  %s1999_s9 = smov [#allocation2]   ;;  %s2000_s11 = smov [#allocation5]  }
   0x3   :  { %s16_s10 = sshll.u32 %s1999_s9, 4  ;;  %s26_s12 = sshll.u32 %s2000_s11, 4  ;;  %s17_s10 = int_to_ptr.vmem [resolvable:$true] %s16_s10  ;;  %s27_s12 = int_to_ptr.vmem [resolvable:$true] %s26_s12 }
   0x4   :  { %s1927_s15 = scalar_lea.hbm %s2207_s0, 128 }
   0x5   :  { %p1928_p0 = scmp.ne.s32.totalorder %s2207_s0, %s1927_s15  ;;  %p1931_p1 = scmp.lt.u32.totalorder %s1927_s15, %s2207_s0 }
   0x7   :  { %p1933_p2 = pnand %p1931_p1, %p1928_p0 }
   0x9   :  { %1936 = shalt.err (!%p1933_p2)
}
   0xa   :  { %s1937_s20 = scalar_lea.vmem %s17_s10, 128  ;;  %p1942_p4 = scmp.lt.s32.totalorder %s17_s10, %s17_s10 }
   0xb   :  { %p1938_p3 = scmp.ne.s32.totalorder %s17_s10, %s1937_s20  ;;  %p1943_p5 = scmp.lt.s32.totalorder %s1937_s20, %s1937_s20 }
   0xd   :  { %p1944_p6 = por %p1943_p5, %p1942_p4 }
   0xf   :  { %p1945_p7 = pnand %p1944_p6, %p1938_p3 }
  0x11   :  { %1948 = shalt.err (!%p1945_p7)
}
  0x12   :  { %19 = dma.hbm_to_vmem [thread:$0]  %s2207_s0, 128, %s17_s10, [#allocation3]  }
  0x13   :  { %s1949_s25 = scalar_lea.hbm %s2208_s1, 128 }
  0x14   :  { %p1950_p8 = scmp.ne.s32.totalorder %s2208_s1, %s1949_s25  ;;  %p1953_p9 = scmp.lt.u32.totalorder %s1949_s25, %s2208_s1 }
  0x16   :  { %p1955_p10 = pnand %p1953_p9, %p1950_p8 }
  0x18   :  { %1958 = shalt.err (!%p1955_p10)
}
  0x19   :  { %s1959_s30 = scalar_lea.vmem %s27_s12, 128  ;;  %p1964_p12 = scmp.lt.s32.totalorder %s27_s12, %s27_s12 }
  0x1a   :  { %p1960_p11 = scmp.ne.s32.totalorder %s27_s12, %s1959_s30  ;;  %p1965_p13 = scmp.lt.s32.totalorder %s1959_s30, %s1959_s30 }
  0x1c   :  { %p1966_p0 = por %p1965_p13, %p1964_p12 }
  0x1e   :  { %p1967_p1 = pnand %p1966_p0, %p1960_p11 }
  0x20   :  { %1970 = shalt.err (!%p1967_p1)
}
  0x21   :  { %29 = dma.hbm_to_vmem [thread:$0]  %s2208_s1, 128, %s27_s12, [#allocation6]  }
  0x22   :  { %1993 = dma.done.wait [#allocation3], 128  }
  0x23   :  { %1994 = vsyncadd [#allocation3], 4294967168 }
  0x24   :  { %1995 = dma.done.wait [#allocation6], 128  }
  0x25   :  { %1996 = vsyncadd [#allocation6], 4294967168  ;;  %v2001_v0 = vmov 0.0   ;;  %vm2002_vm0 = vmmov 0   ;;  %vm39_vm1 = vcmask 261120   ;;  %v36_v1 = vld [vmem:[#allocation2] sm:$0xff]  ;;  %v47_v19 = vlaneseq }
  0x26   :  { %1740 = vmatprep.subr.mxu0 %v2001_v0  ;;  %1725 = vmatprep.subr.mxu1 %v2001_v0  ;;  %v53_v2 = vsel %vm39_vm1, %v36_v1, 0  ;;  %v38_v3 = vmul.f32 %v36_v1, %v36_v1  ;;  %v37_v4 = vld [vmem:[#allocation5] sm:$0xff]  ;;  %vm589_vm3 = vcmask 64512   ;;  %s2003_s8 = smov [#allocation7]   ;;  %vm1671_vm4 = vcmask 0  }
  0x27   :  { %1742 = vmatprep.mubr.msk.f32.mxu0 %vm2002_vm0, %v2001_v0  ;;  %1727 = vmatprep.mubr.msk.f32.mxu1 %vm2002_vm0, %v2001_v0  ;;  %v2050_v5 = vand.u32 4294901760, %v53_v2  ;;  %v43_v7 = vmul.f32 %v37_v4, %v37_v4  ;;  %v601_v10 = vsel %vm39_vm1, %v37_v4, 0  ;;  %v2125_v20 = vshrl.u32 %v47_v19, 7  ;;  %s1679_s9 = sshll.u32 %s2003_s8, 4  ;;  %s1680_s9 = int_to_ptr.vmem [resolvable:$true] %s1679_s9 }
  0x28   :  { %v40_v6 = vsel %vm39_vm1, %v38_v3, 0.0  ;;  %v2062_v13 = vand.u32 4294901760, %v601_v10  ;;  %v2127_v21 = vand.u32 127, %v47_v19  ;;  %s1971_s11 = scalar_lea.vmem %s1680_s9, 16  ;;  %s1975_s12 = scalar_lea.vmem %s1680_s9, 32 }
  0x29   :  { %1741 = vmatpush3.xpose.msra.mxu0 %v2050_v5  ;;  %1726 = vmatpush3.xpose.msra.mxu1 %v2050_v5  ;;  %v122_v8 = vsub.f32 %v53_v2, %v2050_v5  ;;  %v44_v11 = vsel %vm39_vm1, %v43_v7, 0.0  ;;  %p1972_p2 = scmp.ne.s32.totalorder %s1680_s9, %s1971_s11  ;;  %p1976_p3 = scmp.lt.s32.totalorder %s1680_s9, %s1680_s9 }
  0x2a   :  { %1730 = vmatprep.subr.mxu1 %v2001_v0  ;;  %1745 = vmatprep.subr.mxu0 %v2001_v0  ;;  %v670_v15 = vsub.f32 %v601_v10, %v2062_v13  ;;  %v504_v22 = vsub.s32 %v2127_v21, %v2125_v20  ;;  %vm51_vm2 = vcmp.eq.s32.totalorder %v2125_v20, %v2127_v21  ;;  %p1977_p4 = scmp.lt.s32.totalorder %s1975_s12, %s1971_s11 }
  0x2b   :  { %v123_v9 = vand.u32 4294901760, %v122_v8  ;;  %41 = vadd.xlane.f32.xlu0 %v40_v6 }
  0x2c   :  { %v671_v16 = vand.u32 4294901760, %v670_v15  ;;  %p1978_p5 = por %p1977_p4, %p1976_p3 }
  0x2d   :  { %1743 = vmatmul.mubr.f32.vlgmr.msra.gmra.mrb[0].mxu0 %v123_v9  ;;  %v124_v12 = vsub.f32 %v122_v8, %v123_v9 }
  0x2e   :  { %1746 = vmatpush3.xpose.msra.mxu0 %v123_v9  ;;  %1747 = vmatprep.mubr.msk.f32.mxu0 %vm2002_vm0, %v2001_v0  ;;  %v672_v17 = vsub.f32 %v670_v15, %v671_v16  ;;  %p1979_p6 = pnand %p1978_p5, %p1972_p2 }
  0x2f   :  { %v125_v14 = vand.u32 4294901760, %v124_v12  ;;  %1750 = vmatprep.subr.mxu0 %v2001_v0  ;;  %45 = vadd.xlane.f32.xlu0 %v44_v11 }
  0x30   :  { %v673_v18 = vand.u32 4294901760, %v672_v17 }
  0x31   :  { %1728 = vmatmul.mubr.f32.vlgmr.msra.gmra.mrb[0].mxu1 %v125_v14 }
  0x32   :  { %1731 = vmatpush3.xpose.msra.mxu1 %v125_v14  ;;  %1732 = vmatprep.mubr.msk.f32.mxu1 %vm2002_vm0, %v2001_v0 }
  0x33   :  { %1735 = vmatprep.subr.mxu1 %v2001_v0 }
  0x35   :  { %1748 = vmatmul.mubr.f32.vlgmr.msra.gmra.mrb[0].mxu0 %v2050_v5 }
  0x36   :  { %1751 = vmatpush3.xpose.msra.mxu0 %v2050_v5  ;;  %1752 = vmatprep.mubr.msk.f32.mxu0 %vm2002_vm0, %v2001_v0 }
  0x37   :  { %1785 = vmatprep.subr.mxu0 %v2001_v0 }
  0x39   :  { %1733 = vmatmul.mubr.f32.vlgmr.msra.gmra.mrb[0].mxu1 %v2050_v5 }
  0x3a   :  { %1736 = vmatpush3.xpose.msra.mxu1 %v122_v8  ;;  %1737 = vmatprep.mubr.msk.f32.mxu1 %vm2002_vm0, %v2001_v0 }
  0x3b   :  { %1755 = vmatprep.subr.mxu1 %v2001_v0 }
  0x3d   :  { %1753 = vmatmul.mubr.f32.vlgmr.msra.gmra.mrb[0].mxu0 %v2050_v5 }
  0x3e   :  { %1786 = vmatpush3.xpose.msra.mxu0 %v2062_v13  ;;  %1787 = vmatprep.mubr.msk.f32.mxu0 %vm2002_vm0, %v2001_v0 }
  0x3f   :  { %1790 = vmatprep.subr.mxu0 %v2001_v0 }
  0x41   :  { %1738 = vmatmul.mubr.f32.vlgmr.msra.gmra.mrb[0].mxu1 %v122_v8  ;;  %1788 = vmatmul.mubr.f32.vlgmr.msra.gmra.mrb[2].mxu0 %v125_v14 }
  0x42   :  { %1756 = vmatpush3.xpose.msra.mxu1 %v2062_v13  ;;  %1757 = vmatprep.mubr.msk.f32.mxu1 %vm2002_vm0, %v2001_v0 }
  0x43   :  { %1760 = vmatprep.subr.mxu1 %v2001_v0  ;;  %1791 = vmatpush3.xpose.msra.mxu0 %v673_v18 }
  0x44   :  { %1792 = vmatprep.mubr.msk.f32.mxu0 %vm2002_vm0, %v2001_v0  ;;  %1795 = vmatprep.subr.mxu0 %v2001_v0 }
  0x45   :  { %1758 = vmatmul.mubr.f32.vlgmr.msra.gmra.mrb[2].mxu1 %v673_v18 }
  0x46   :  { %1761 = vmatpush3.xpose.msra.mxu1 %v673_v18  ;;  %1762 = vmatprep.mubr.msk.f32.mxu1 %vm2002_vm0, %v2001_v0 }
  0x47   :  { %1765 = vmatprep.subr.mxu1 %v2001_v0 }
  0x49   :  { %1793 = vmatmul.mubr.f32.vlgmr.msra.gmra.mrb[2].mxu0 %v2050_v5 }
  0x4a   :  { %1796 = vmatpush3.xpose.msra.mxu0 %v670_v15  ;;  %1797 = vmatprep.mubr.msk.f32.mxu0 %vm2002_vm0, %v2001_v0 }
  0x4b   :  { %1800 = vmatprep.subr.mxu0 %v2001_v0 }
  0x4d   :  { %1763 = vmatmul.mubr.f32.vlgmr.msra.gmra.mrb[2].mxu1 %v2062_v13 }
  0x4e   :  { %1766 = vmatpush3.xpose.msra.mxu1 %v670_v15  ;;  %1767 = vmatprep.mubr.msk.f32.mxu1 %vm2002_vm0, %v2001_v0 }
  0x4f   :  { %1770 = vmatprep.subr.mxu1 %v2001_v0 }
  0x51   :  { %1798 = vmatmul.mubr.f32.vlgmr.msra.gmra.mrb[2].mxu0 %v122_v8 }
  0x52   :  { %1801 = vmatpush3.xpose.msra.mxu0 %v2062_v13  ;;  %1802 = vmatprep.mubr.msk.f32.mxu0 %vm2002_vm0, %v2001_v0 }
  0x53   :  { %1805 = vmatprep.subr.mxu0 %v2001_v0 }
  0x55   :  { %1768 = vmatmul.mubr.f32.vlgmr.msra.gmra.mrb[2].mxu1 %v670_v15 }
  0x56   :  { %1771 = vmatpush3.xpose.msra.mxu1 %v2062_v13  ;;  %1772 = vmatprep.mubr.msk.f32.mxu1 %vm2002_vm0, %v2001_v0 }
  0x57   :  { %1775 = vmatprep.subr.mxu1 %v2001_v0 }
  0x59   :  { %1803 = vmatmul.mubr.f32.vlgmr.msra.gmra.mrb[2].mxu0 %v123_v9 }
  0x5a   :  { %1806 = vmatpush3.xpose.msra.mxu0 %v671_v16  ;;  %1807 = vmatprep.mubr.msk.f32.mxu0 %vm2002_vm0, %v2001_v0 }
  0x5b   :  { %1810 = vmatprep.subr.mxu0 %v2001_v0 }
  0x5d   :  { %1773 = vmatmul.mubr.f32.vlgmr.msra.gmra.mrb[2].mxu1 %v671_v16 }
  0x5e   :  { %1776 = vmatpush3.xpose.msra.mxu1 %v671_v16  ;;  %1777 = vmatprep.mubr.msk.f32.mxu1 %vm2002_vm0, %v2001_v0 }
  0x5f   :  { %1780 = vmatprep.subr.mxu1 %v2001_v0 }
  0x61   :  { %1808 = vmatmul.mubr.f32.vlgmr.msra.gmra.mrb[2].mxu0 %v2050_v5 }
  0x62   :  { %1811 = vmatpush3.xpose.msra.mxu0 %v2062_v13  ;;  %1812 = vmatprep.mubr.msk.f32.mxu0 %vm2002_vm0, %v2001_v0 }
  0x65   :  { %1778 = vmatmul.mubr.f32.vlgmr.msra.gmra.mrb[2].mxu1 %v2062_v13 }
  0x66   :  { %1781 = vmatpush3.xpose.msra.mxu1 %v2062_v13  ;;  %1782 = vmatprep.mubr.msk.f32.mxu1 %vm2002_vm0, %v2001_v0 }
  0x69   :  { %1813 = vmatmul.mubr.f32.vlgmr.msra.gmra.mrb[2].mxu0 %v2050_v5 }
  0x6d   :  { %1783 = vmatmul.mubr.f32.vlgmr.msra.gmra.mrb[2].mxu1 %v2062_v13 }
  0xb8   :  { %v2131_v23 = vpop.xlane.xlu0 %41 }
  0xb9   :  { %v505_v26 = vrot.slane %v2131_v23, %v504_v22 }
  0xbb   :  { %v519_v29 = vadd.f32 %v505_v26, %v2131_v23 }
  0xbc   :  { %v46_v0 = vpop.xlane.xlu0 %45 }
  0xbd   :  { %v1053_v4 = vrot.slane %v46_v0, %v504_v22 }
  0xbf   :  { %v1587_v13 = vadd.f32 %v1053_v4, %v2131_v23 }
 0x110   :  { %v497_v24 = vpop.f32.mrb[0].mxu0 }
 0x111   :  { %v1754_v25 = vpop.f32.mrb[1].mxu0 }
 0x114   :  { %v277_v27 = vpop.f32.mrb[0].mxu1 }
 0x115   :  { %v1815_v28 = vadd.f32 %v497_v24, %v277_v27  ;;  %v1739_v30 = vpop.f32.mrb[1].mxu1 }
 0x117   :  { %v520_v31 = vmul.f32 2.0, %v1815_v28  ;;  %v1061_v28 = vadd.f32 %v1053_v4, %v46_v0 }
 0x119   :  { %v521_v32 = vsub.f32 %v519_v29, %v520_v31 }
 0x11b   :  { %v522_v33 = vmax.f32 %v521_v32, 0.0 }
 0x11d   :  { %v523_v34 = vsel %vm51_vm2, 0.0, %v522_v33 }
 0x11e   :  { %v524_v35 = vsub.f32 0.0, %v523_v34 }
 0x120   :  { %v552_v36 = vmul.f32 5.0, %v524_v35  ;;  %v525_v37 = vmul.f32 1e-06, %v524_v35  ;;  %v529_v38 = vmul.f32 1e-05, %v524_v35  ;;  %v568_v49 = vmul.f32 100.0, %v524_v35 }
 0x121   :  { %v533_v39 = vmul.f32 0.0001, %v524_v35  ;;  %v537_v40 = vmul.f32 0.001, %v524_v35  ;;  %v541_v45 = vmul.f32 0.01, %v524_v35 }
 0x122   :  { %v553_v41 = vmul.f32 1.442695, %v552_v36  ;;  %v526_v42 = vmul.f32 1.442695, %v525_v37  ;;  %v530_v43 = vmul.f32 1.442695, %v529_v38 }
 0x123   :  { %v534_v44 = vmul.f32 1.442695, %v533_v39  ;;  %v538_v46 = vmul.f32 1.442695, %v537_v40  ;;  %v545_v47 = vmul.f32 0.1, %v524_v35 }
 0x124   :  { %1855 = vpow2.f32 %v553_v41  ;;  %v542_v48 = vmul.f32 1.442695, %v541_v45  ;;  %v549_v51 = vmul.f32 1.442695, %v524_v35  ;;  %v569_v52 = vmul.f32 1.442695, %v568_v49 }
 0x125   :  { %1857 = vpow2.f32 %v526_v42  ;;  %v546_v50 = vmul.f32 1.442695, %v545_v47  ;;  %v577_v9 = vmul.f32 10000.0, %v524_v35  ;;  %v581_v12 = vmul.f32 100000.0, %v524_v35 }
 0x126   :  { %1859 = vpow2.f32 %v530_v43  ;;  %v585_v27 = vmul.f32 1000000.0, %v524_v35 }
 0x127   :  { %1861 = vpow2.f32 %v534_v44  ;;  %v578_v24 = vmul.f32 1.442695, %v577_v9  ;;  %v582_v22 = vmul.f32 1.442695, %v581_v12 }
 0x128   :  { %1863 = vpow2.f32 %v538_v46  ;;  %v586_v38 = vmul.f32 1.442695, %v585_v27 }
 0x129   :  { %1865 = vpow2.f32 %v542_v48 }
 0x12a   :  { %1867 = vpow2.f32 %v546_v50 }
 0x12b   :  { %1869 = vpow2.f32 %v549_v51 }
 0x12c   :  { %1871 = vpow2.f32 %v569_v52 }
 0x12d   :  { %1873 = vpow2.f32 %v578_v24 }
 0x12e   :  { %v1856_v53 = vpop.eup %1855  ;;  %1875 = vpow2.f32 %v582_v22 }
 0x12f   :  { %v1858_v54 = vpop.eup %1857  ;;  %v556_v56 = vmul.f32 %v1856_v53, %v1856_v53  ;;  %1877 = vpow2.f32 %v586_v38 }
 0x130   :  { %v1860_v55 = vpop.eup %1859 }
 0x131   :  { %v532_v57 = vadd.f32 %v1860_v55, %v1858_v54  ;;  %v1862_v58 = vpop.eup %1861  ;;  %v558_v61 = vmul.f32 %v1856_v53, %v556_v56 }
 0x132   :  { %v1864_v60 = vpop.eup %1863 }
 0x133   :  { %v536_v59 = vadd.f32 %v1862_v58, %v532_v57  ;;  %v1866_v63 = vpop.eup %1865  ;;  %v560_v3 = vmul.f32 %v1856_v53, %v558_v61 }
 0x134   :  { %v1868_v2 = vpop.eup %1867 }
 0x135   :  { %v540_v62 = vadd.f32 %v1864_v60, %v536_v59  ;;  %v1870_v6 = vpop.eup %1869  ;;  %v562_v11 = vmul.f32 %v1856_v53, %v560_v3 }
 0x136   :  { %v1872_v7 = vpop.eup %1871 }
 0x137   :  { %v544_v1 = vadd.f32 %v1866_v63, %v540_v62  ;;  %v571_v17 = vmul.f32 %v1872_v7, %v1872_v7  ;;  %v564_v26 = vmul.f32 %v1856_v53, %v562_v11  ;;  %v1874_v21 = vpop.eup %1873 }
 0x138   :  { %v1876_v62 = vpop.eup %1875 }
 0x139   :  { %v548_v5 = vadd.f32 %v1868_v2, %v544_v1  ;;  %v572_v33 = vmul.f32 %v571_v17, %v571_v17  ;;  %v566_v37 = vmul.f32 %v1856_v53, %v564_v26 }
 0x13b   :  { %v551_v8 = vadd.f32 %v1870_v6, %v548_v5  ;;  %v573_v42 = vmul.f32 %v572_v33, %v572_v33 }
 0x13c   :  { %v1583_v10 = vpop.f32.mrb[2].mxu0 }
 0x13d   :  { %v1588_v14 = vmul.f32 2.0, %v1583_v10  ;;  %v1814_v15 = vpop.f32.mrb[3].mxu0  ;;  %v555_v16 = vadd.f32 %v1856_v53, %v551_v8  ;;  %v1878_v8 = vpop.eup %1877 }
 0x13f   :  { %v1589_v18 = vsub.f32 %v1587_v13, %v1588_v14  ;;  %v557_v19 = vadd.f32 %v556_v56, %v555_v16  ;;  %v575_v56 = vmul.f32 %v573_v42, %v571_v17 }
 0x140   :  { %v1045_v25 = vpop.f32.mrb[2].mxu1 }
 0x141   :  { %v1590_v29 = vmax.f32 %v1589_v18, 0.0  ;;  %v1062_v30 = vmul.f32 2.0, %v1045_v25  ;;  %v1784_v31 = vpop.f32.mrb[3].mxu1  ;;  %v559_v32 = vadd.f32 %v558_v61, %v557_v19 }
 0x143   :  { %v2141_v34 = vsub.f32 0.0, %v1590_v29  ;;  %v1063_v23 = vsub.f32 %v1061_v28, %v1062_v30  ;;  %v561_v36 = vadd.f32 %v560_v3, %v559_v32 }
 0x145   :  { %v1619_v39 = vmul.f32 5.0, %v2141_v34  ;;  %v1064_v40 = vmax.f32 %v1063_v23, 0.0  ;;  %v563_v41 = vadd.f32 %v562_v11, %v561_v36  ;;  %v1592_v35 = vmul.f32 1e-06, %v2141_v34 }
 0x146   :  { %v1596_v43 = vmul.f32 1e-05, %v2141_v34  ;;  %v1600_v44 = vmul.f32 0.0001, %v2141_v34  ;;  %v1604_v45 = vmul.f32 0.001, %v2141_v34 }
 0x147   :  { %v1620_v46 = vmul.f32 1.442695, %v1619_v39  ;;  %v1065_v47 = vsel %vm51_vm2, 0.0, %v1064_v40  ;;  %v565_v48 = vadd.f32 %v564_v26, %v563_v41  ;;  %v1593_v49 = vmul.f32 1.442695, %v1592_v35 }
 0x148   :  { %v2151_v50 = vsub.f32 0.0, %v1065_v47  ;;  %v1597_v51 = vmul.f32 1.442695, %v1596_v43  ;;  %v1601_v53 = vmul.f32 1.442695, %v1600_v44  ;;  %v1635_v61 = vmul.f32 100.0, %v2141_v34 }
 0x149   :  { %1879 = vpow2.f32 %v1620_v46  ;;  %v567_v52 = vadd.f32 %v566_v37, %v565_v48  ;;  %v1608_v54 = vmul.f32 0.01, %v2141_v34  ;;  %v1605_v58 = vmul.f32 1.442695, %v1604_v45 }
 0x14a   :  { %v1094_v55 = vmul.f32 5.0, %v2151_v50  ;;  %1881 = vpow2.f32 %v1593_v49  ;;  %v1612_v20 = vmul.f32 0.1, %v2141_v34  ;;  %v1067_v0 = vmul.f32 1e-06, %v2151_v50 }
 0x14b   :  { %v574_v57 = vadd.f32 %v1872_v7, %v567_v52  ;;  %1883 = vpow2.f32 %v1597_v51  ;;  %v1609_v60 = vmul.f32 1.442695, %v1608_v54  ;;  %v1071_v3 = vmul.f32 1e-05, %v2151_v50 }
 0x14c   :  { %1885 = vpow2.f32 %v1601_v53  ;;  %v1095_v63 = vmul.f32 1.442695, %v1094_v55  ;;  %v1613_v2 = vmul.f32 1.442695, %v1612_v20  ;;  %v1616_v4 = vmul.f32 1.442695, %v2141_v34 }
 0x14d   :  { %v576_v59 = vadd.f32 %v575_v56, %v574_v57  ;;  %1887 = vpow2.f32 %v1605_v58  ;;  %v1636_v6 = vmul.f32 1.442695, %v1635_v61  ;;  %v1075_v7 = vmul.f32 0.0001, %v2151_v50 }
 0x14e   :  { %1889 = vpow2.f32 %v1609_v60  ;;  %v1068_v9 = vmul.f32 1.442695, %v1067_v0  ;;  %v1072_v12 = vmul.f32 1.442695, %v1071_v3  ;;  %v1079_v13 = vmul.f32 0.001, %v2151_v50 }
 0x14f   :  { %v580_v1 = vadd.f32 %v1874_v21, %v576_v59  ;;  %1891 = vpow2.f32 %v1095_v63  ;;  %v1076_v17 = vmul.f32 1.442695, %v1075_v7  ;;  %v1083_v18 = vmul.f32 0.01, %v2151_v50 }
 0x150   :  { %1893 = vpow2.f32 %v1613_v2  ;;  %v1080_v25 = vmul.f32 1.442695, %v1079_v13  ;;  %v1087_v26 = vmul.f32 0.1, %v2151_v50  ;;  %v1110_v33 = vmul.f32 100.0, %v2151_v50 }
 0x151   :  { %v584_v5 = vadd.f32 %v1876_v62, %v580_v1  ;;  %1895 = vpow2.f32 %v1616_v4  ;;  %v1084_v29 = vmul.f32 1.442695, %v1083_v18  ;;  %v1091_v39 = vmul.f32 1.442695, %v2151_v50 }
 0x152   :  { %1897 = vpow2.f32 %v1636_v6  ;;  %v1088_v32 = vmul.f32 1.442695, %v1087_v26  ;;  %v1111_v42 = vmul.f32 1.442695, %v1110_v33  ;;  %v1644_v47 = vmul.f32 10000.0, %v2141_v34 }
 0x153   :  { %v2161_v10 = vpop.eup %1879  ;;  %v588_v11 = vadd.f32 %v1878_v8, %v584_v5  ;;  %1899 = vpow2.f32 %v1068_v9  ;;  %v1648_v52 = vmul.f32 100000.0, %v2141_v34  ;;  %v1652_v21 = vmul.f32 1000000.0, %v2141_v34 }
 0x154   :  { %v1882_v14 = vpop.eup %1881  ;;  %1901 = vpow2.f32 %v1072_v12  ;;  %v1623_v27 = vmul.f32 %v2161_v10, %v2161_v10  ;;  %v1645_v20 = vmul.f32 1.442695, %v1644_v47 }
 0x155   :  { %v1884_v15 = vpop.eup %1883  ;;  %v590_v16 = vsel %vm589_vm3, %v588_v11, 0.0  ;;  %1903 = vpow2.f32 %v1076_v17  ;;  %v1649_v62 = vmul.f32 1.442695, %v1648_v52  ;;  %v1653_v5 = vmul.f32 1.442695, %v1652_v21 }
 0x156   :  { %591 = vadd.xlane.f32.xlu1 %v590_v16  ;;  %v1599_v19 = vadd.f32 %v1884_v15, %v1882_v14  ;;  %v1886_v24 = vpop.eup %1885  ;;  %1905 = vpow2.f32 %v1080_v25  ;;  %v1625_v37 = vmul.f32 %v2161_v10, %v1623_v27  ;;  %v1119_v15 = vmul.f32 10000.0, %v2151_v50 }
 0x157   :  { %v1888_v28 = vpop.eup %1887  ;;  %1907 = vpow2.f32 %v1084_v29 }
 0x158   :  { %v1603_v22 = vadd.f32 %v1886_v24, %v1599_v19  ;;  %v1890_v31 = vpop.eup %1889  ;;  %1909 = vpow2.f32 %v1088_v32  ;;  %v1627_v45 = vmul.f32 %v2161_v10, %v1625_v37  ;;  %v1123_v19 = vmul.f32 100000.0, %v2151_v50 }
 0x159   :  { %v2170_v23 = vpop.eup %1891  ;;  %1911 = vpow2.f32 %v1091_v39 }
 0x15a   :  { %v1607_v30 = vadd.f32 %v1888_v28, %v1603_v22  ;;  %v1894_v38 = vpop.eup %1893  ;;  %v1098_v53 = vmul.f32 %v2170_v23, %v2170_v23  ;;  %1913 = vpow2.f32 %v1111_v42  ;;  %v1629_v55 = vmul.f32 %v2161_v10, %v1627_v45 }
 0x15b   :  { %v1896_v40 = vpop.eup %1895  ;;  %1915 = vpow2.f32 %v1645_v20 }
 0x15c   :  { %v1611_v36 = vadd.f32 %v1890_v31, %v1607_v30  ;;  %v1898_v35 = vpop.eup %1897  ;;  %v1100_v63 = vmul.f32 %v2170_v23, %v1098_v53  ;;  %v1631_v1 = vmul.f32 %v2161_v10, %v1629_v55  ;;  %1917 = vpow2.f32 %v1649_v62 }
 0x15d   :  { %v1900_v43 = vpop.eup %1899  ;;  %v1638_v56 = vmul.f32 %v1898_v35, %v1898_v35  ;;  %1919 = vpow2.f32 %v1653_v5  ;;  %v1124_v31 = vmul.f32 1.442695, %v1123_v19 }
 0x15e   :  { %v1615_v41 = vadd.f32 %v1894_v38, %v1611_v36  ;;  %v1902_v46 = vpop.eup %1901  ;;  %v1102_v34 = vmul.f32 %v2170_v23, %v1100_v63  ;;  %v1633_v11 = vmul.f32 %v2161_v10, %v1631_v1 }
 0x15f   :  { %v1074_v49 = vadd.f32 %v1902_v46, %v1900_v43  ;;  %v1904_v51 = vpop.eup %1903  ;;  %v1639_v2 = vmul.f32 %v1638_v56, %v1638_v56 }
 0x160   :  { %v1618_v44 = vadd.f32 %v1896_v40, %v1615_v41  ;;  %v1906_v58 = vpop.eup %1905  ;;  %v1104_v18 = vmul.f32 %v2170_v23, %v1102_v34 }
 0x161   :  { %v1078_v57 = vadd.f32 %v1904_v51, %v1074_v49  ;;  %v1908_v61 = vpop.eup %1907  ;;  %v1640_v12 = vmul.f32 %v1639_v2, %v1639_v2 }
 0x162   :  { %v1622_v48 = vadd.f32 %v2161_v10, %v1618_v44  ;;  %v1910_v4 = vpop.eup %1909  ;;  %v1127_v10 = vmul.f32 1000000.0, %v2151_v50  ;;  %v1106_v36 = vmul.f32 %v2170_v23, %v1104_v18 }
 0x163   :  { %v1082_v60 = vadd.f32 %v1906_v58, %v1078_v57  ;;  %v1912_v8 = vpop.eup %1911  ;;  %v1642_v25 = vmul.f32 %v1640_v12, %v1638_v56 }
 0x164   :  { %v1624_v54 = vadd.f32 %v1623_v27, %v1622_v48  ;;  %v1914_v14 = vpop.eup %1913  ;;  %v1120_v27 = vmul.f32 1.442695, %v1119_v15  ;;  %v1128_v39 = vmul.f32 1.442695, %v1127_v10  ;;  %v1108_v50 = vmul.f32 %v2170_v23, %v1106_v36 }
 0x165   :  { %v1086_v3 = vadd.f32 %v1908_v61, %v1082_v60  ;;  %v1113_v22 = vmul.f32 %v1914_v14, %v1914_v14  ;;  %v1916_v30 = vpop.eup %1915 }
 0x166   :  { %v1626_v59 = vadd.f32 %v1625_v37, %v1624_v54  ;;  %v1918_v38 = vpop.eup %1917  ;;  %1921 = vpow2.f32 %v1120_v27 }
 0x167   :  { %v1090_v7 = vadd.f32 %v1910_v4, %v1086_v3  ;;  %v1114_v37 = vmul.f32 %v1113_v22, %v1113_v22  ;;  %1923 = vpow2.f32 %v1124_v31 }
 0x168   :  { %v1628_v0 = vadd.f32 %v1627_v45, %v1626_v59  ;;  %1925 = vpow2.f32 %v1128_v39 }
 0x169   :  { %v1093_v13 = vadd.f32 %v1912_v8, %v1090_v7  ;;  %v1115_v44 = vmul.f32 %v1114_v37, %v1114_v37 }
 0x16a   :  { %v1630_v6 = vadd.f32 %v1629_v55, %v1628_v0 }
 0x16b   :  { %v1097_v17 = vadd.f32 %v2170_v23, %v1093_v13  ;;  %v1117_v48 = vmul.f32 %v1115_v44, %v1113_v22 }
 0x16c   :  { %v1632_v9 = vadd.f32 %v1631_v1, %v1630_v6 }
 0x16d   :  { %v1099_v26 = vadd.f32 %v1098_v53, %v1097_v17 }
 0x16e   :  { %v1634_v16 = vadd.f32 %v1633_v11, %v1632_v9 }
 0x16f   :  { %v1101_v29 = vadd.f32 %v1100_v63, %v1099_v26 }
 0x170   :  { %v1641_v24 = vadd.f32 %v1898_v35, %v1634_v16  ;;  %v1920_v35 = vpop.eup %1919 }
 0x171   :  { %v1103_v33 = vadd.f32 %v1102_v34, %v1101_v29  ;;  %v1922_v51 = vpop.eup %1921 }
 0x172   :  { %v1643_v28 = vadd.f32 %v1642_v25, %v1641_v24  ;;  %v1924_v53 = vpop.eup %1923 }
 0x173   :  { %v1105_v41 = vadd.f32 %v1104_v18, %v1103_v33  ;;  %v1926_v55 = vpop.eup %1925 }
 0x174   :  { %v1647_v32 = vadd.f32 %v1916_v30, %v1643_v28 }
 0x175   :  { %v1107_v43 = vadd.f32 %v1106_v36, %v1105_v41 }
 0x176   :  { %v1651_v40 = vadd.f32 %v1918_v38, %v1647_v32 }
 0x177   :  { %v1109_v46 = vadd.f32 %v1108_v50, %v1107_v43 }
 0x178   :  { %v1655_v42 = vadd.f32 %v1920_v35, %v1651_v40 }
 0x179   :  { %v1116_v47 = vadd.f32 %v1914_v14, %v1109_v46 }
 0x17a   :  { %v1656_v45 = vsel %vm589_vm3, %v1655_v42, 0.0 }
 0x17b   :  { %1657 = vadd.xlane.f32.xlu0 %v1656_v45  ;;  %v1118_v49 = vadd.f32 %v1117_v48, %v1116_v47 }
 0x17d   :  { %v1122_v52 = vadd.f32 %v1922_v51, %v1118_v49 }
 0x17f   :  { %v1126_v54 = vadd.f32 %v1924_v53, %v1122_v52 }
 0x181   :  { %v1130_v56 = vadd.f32 %v1926_v55, %v1126_v54 }
 0x183   :  { %v1131_v57 = vsel %vm589_vm3, %v1130_v56, 0.0 }
 0x184   :  { %1132 = vadd.xlane.f32.xlu1 %v1131_v57 }
 0x1e3   :  { %v592_v58 = vpop.xlane.xlu1 %591 }
 0x1e4   :  { %v593_v23 = vrot.slane %v592_v58, 4 }
 0x1e6   :  { %v594_v20 = vadd.f32 %v593_v23, %v592_v58 }
 0x1e8   :  { %v595_v21 = vrot.slane %v594_v20, 2 }
 0x1ea   :  { %v596_v59 = vadd.f32 %v595_v21, %v594_v20 }
 0x1ec   :  { %v597_v60 = vrot.slane %v596_v59, 1 }
 0x1ee   :  { %v598_v61 = vadd.f32 %v597_v60, %v596_v59 }
 0x1f0   :  { %1844 = vpush %v598_v61 }
 0x208   :  { %v1658_v62 = vpop.xlane.xlu0 %1657 }
 0x209   :  { %v1659_v63 = vrot.slane %v1658_v62, 4 }
 0x20b   :  { %v1660_v0 = vadd.f32 %v1659_v63, %v1658_v62 }
 0x20d   :  { %v1661_v1 = vrot.slane %v1660_v0, 2 }
 0x20f   :  { %v1662_v5 = vadd.f32 %v1661_v1, %v1660_v0 }
 0x211   :  { %v1133_v2 = vpop.xlane.xlu1 %1132  ;;  %v1663_v8 = vrot.slane %v1662_v5, 1 }
 0x212   :  { %v1134_v3 = vrot.slane %v1133_v2, 4 }
 0x213   :  { %v1664_v11 = vadd.f32 %v1663_v8, %v1662_v5 }
 0x214   :  { %v1135_v4 = vadd.f32 %v1134_v3, %v1133_v2 }
 0x216   :  { %v1136_v6 = vrot.slane %v1135_v4, 2 }
 0x218   :  { %v1137_v7 = vadd.f32 %v1136_v6, %v1135_v4 }
 0x21a   :  { %v1138_v34 = vrot.slane %v1137_v7, 1 }
 0x21c   :  { %v1139_v9 = vadd.f32 %v1138_v34, %v1137_v7 }
 0x21e   :  { %1846 = vpush %v1139_v9 }
 0x21f   :  { %1848 = vpush %v1664_v11 }
 0x221   :  { %s1845_s1 = spop %1844 }
 0x24f   :  { %s1847_s4 = spop %1846 }
 0x250   :  { %s1666_s5 = sadd.f32 %s1847_s4, %s1845_s1  ;;  %s1849_s6 = spop %1848 }
 0x251   :  { %s1667_s7 = smul.f32 2.0, %s1849_s6 }
 0x253   :  { %s1668_s10 = ssub.f32 %s1666_s5, %s1667_s7 }
 0x255   :  { %v1669_v12 = vstv %s1668_s10 }
 0x256   :  { %1672 = vst.msk [vmem:[#allocation7] sm:$0x1] %vm1671_vm4, %v1669_v12 }
 0x257   :  { %1982 = shalt.err (!%p1979_p6)
}
 0x258   :  { %s1983_s15 = scalar_lea.hbm %s2209_s2, 16 }
 0x259   :  { %p1984_p7 = scmp.ne.s32.totalorder %s2209_s2, %s1983_s15  ;;  %p1987_p8 = scmp.lt.u32.totalorder %s1983_s15, %s2209_s2 }
 0x25b   :  { %p1989_p9 = pnand %p1987_p8, %p1984_p7 }
 0x25d   :  { %1992 = shalt.err (!%p1989_p9)
}
 0x25e   :  { %1682 = dma.vmem_to_hbm [thread:$0]  %s1680_s9, 16, %s2209_s2, [#allocation4]  }
 0x25f   :  { %1997 = dma.done.wait [#allocation4], 16  }
 0x260   :  { %1998 = vsyncadd [#allocation4], 4294967280 }
 0x261   :  { %1686 = vsyncpa [#allocation3], 1 }
 0x262   :  { %1687 = vsyncpa [#allocation6], 1 }
 0x263   :  { %1688 = vsyncpa [#allocation4], 1 }

</bundles_post_ra>
